<compile_context>
chip_gen: v7x
topology: tpu7x:2x2x1
jax: 0.10.0
libtpu: 0.0.40
codegen_flags: <defaults>
</compile_context>

<pallas_src>
import functools

import jax
import jax.numpy as jnp
from jax.experimental import pallas as pl
from jax.experimental.pallas import tpu as pltpu


_C1 = 0.7978845608028654          # sqrt(2/pi)
_C2 = 0.044715 * _C1              # folded: 0.044715 * sqrt(2/pi)


def _gelu_new_folded(x):
    # GPT-2 "gelu_new" with folded constants: x*(0.5 + 0.5*tanh(x*(c1+c2*x^2))).
    # x*x keeps the cube on the VPU; only tanh hits the EUP.
    u = x * (_C1 + _C2 * (x * x))
    return x * (0.5 + 0.5 * jnp.tanh(u))


def _gelu_new_ref(x):
    # Reference form (HF ACT2FN["gelu_new"]) for test comparison.
    return 0.5 * x * (1.0 + jnp.tanh(_C1 * (x + 0.044715 * (x * x * x))))


def _round_up(x, m):
    return ((x + m - 1) // m) * m


def mlp_resident_kernel(x_ref, w1_ref, b1_ref, w2_ref, b2_ref, o_ref, *, act_dtype):
    """Weights fully VMEM-resident: one M tile per grid step, no K loop."""
    h = jnp.dot(x_ref[...], w1_ref[...], preferred_element_type=jnp.float32)
    h = (h + b1_ref[...].astype(jnp.float32)).astype(act_dtype)
    h = _gelu_new_folded(h)
    out = jnp.dot(h.astype(w2_ref.dtype), w2_ref[...],
                  preferred_element_type=jnp.float32)
    out = out + b2_ref[...].astype(jnp.float32)
    # dropout: eval-mode -> identity.
    o_ref[...] = out.astype(o_ref.dtype)


def mlp_streamed_kernel(x_ref, w1_ref, b1_ref, w2_ref, b2_ref, o_ref, acc_ref,
                        *, act_dtype):
    """One (M-tile, K-chunk) grid step of the fused MLP.

    x_ref  : (tm, nx)     activation tile (native dtype, e.g. bf16)
    w1_ref : (nx, tk)     c_fc weight column chunk
    b1_ref : (1, tk)      c_fc bias chunk
    w2_ref : (tk, nx)     c_proj weight row chunk
    b2_ref : (1, nx)      c_proj bias (resident)
    o_ref  : (tm, nx)     output tile (written on the last K step)
    acc_ref: (tm, nx) f32 scratch accumulator (resident across K)
    """
    k = pl.program_id(1)

    # c_fc column chunk: full contraction over nx, f32 accumulate on the MXU.
    h = jnp.dot(x_ref[...], w1_ref[...], preferred_element_type=jnp.float32)
    h = (h + b1_ref[...].astype(jnp.float32)).astype(act_dtype)
    h = _gelu_new_folded(h)

    # c_proj partial product for this K chunk.
    part = jnp.dot(h.astype(w2_ref.dtype), w2_ref[...],
                   preferred_element_type=jnp.float32)

    @pl.when(k == 0)
    def _():
        acc_ref[...] = part          # init-by-store: no zero pass, no RMW.

    @pl.when(k != 0)
    def _():
        acc_ref[...] += part

    @pl.when(k == pl.num_programs(1) - 1)
    def _():
        out = acc_ref[...] + b2_ref[...].astype(jnp.float32)
        # dropout: eval-mode -> identity.
        o_ref[...] = out.astype(o_ref.dtype)


@functools.partial(
    jax.jit,
    static_argnames=("tm", "tk", "vmem_limit_bytes", "weights_resident",
                     "resident_vmem_budget_bytes", "act_dtype"))
def mlp_forward(x, w1, b1, w2, b2, *, tm=512, tk=1024, vmem_limit_bytes=None,
                weights_resident=None, resident_vmem_budget_bytes=24 << 20,
                act_dtype=None):
    """x: [B, T, nx] -> [B, T, nx];  out = gelu_new(x @ w1 + b1) @ w2 + b2."""
    B, T, nx = x.shape
    inner = w1.shape[1]
    M = B * T
    dtype = x.dtype

    if act_dtype is None:
        # bf16 activation on bf16 inputs (fast VPU/EUP path on v6e/v7x);
        # pass act_dtype=jnp.float32 explicitly on v5e if preferred.
        act_dtype = jnp.bfloat16 if x.dtype.name == "bfloat16" else jnp.float32

    # --- hardware-friendly padding ----------------------------------------
    # Zero padding is exact: padded W1 columns / W2 rows contribute 0 and the
    # padded output rows/cols are sliced off at the end.
    nx_p = _round_up(nx, 128)
    inner_p = _round_up(inner, 128)

    # tk: 128-multiple divisor of inner_p (no padded reduction columns).
    tk_eff = max(128, min(tk, inner_p)) // 128 * 128
    while inner_p % tk_eff:
        tk_eff -= 128

    # tm: clamp to M, round to 16 sublanes; ensure >=2 M tiles whenever M
    # allows it so the "parallel" axis can shard across both v7x TensorCores.
    tm_eff = min(_round_up(tm, 16), _round_up(M, 16))
    if _round_up(M, tm_eff) // tm_eff < 2:
        half = _round_up(-(-M // 2), 16)
        if half < tm_eff:
            tm_eff = half
    m_p = _round_up(M, tm_eff)

    x2d = jnp.pad(x.reshape(M, nx), ((0, m_p - M), (0, nx_p - nx)))
    w1_p = jnp.pad(w1, ((0, nx_p - nx), (0, inner_p - inner)))
    b1_p = jnp.pad(b1, (0, inner_p - inner)).reshape(1, inner_p)
    w2_p = jnp.pad(w2, ((0, inner_p - inner), (0, nx_p - nx)))
    b2_p = jnp.pad(b2, (0, nx_p - nx)).reshape(1, nx_p)

    # --- path selection ----------------------------------------------------
    itemsize = jnp.dtype(dtype).itemsize
    weight_bytes = (2 * nx_p * inner_p + inner_p + nx_p) * itemsize
    io_bytes = 2 * 2 * tm_eff * nx_p * itemsize          # double-buffered x/out tiles
    if weights_resident is None:
        weights_resident = (2 * weight_bytes + io_bytes) <= resident_vmem_budget_bytes

    if weights_resident:
        kernel = functools.partial(mlp_resident_kernel, act_dtype=act_dtype)
        out2d = pl.pallas_call(
            kernel,
            out_shape=jax.ShapeDtypeStruct((m_p, nx_p), dtype),
            grid_spec=pltpu.PrefetchScalarGridSpec(
                num_scalar_prefetch=0,
                grid=(m_p // tm_eff,),
                in_specs=[
                    pl.BlockSpec((tm_eff, nx_p), lambda i: (i, 0)),   # x tile
                    pl.BlockSpec((nx_p, inner_p), lambda i: (0, 0)),  # W1 (resident)
                    pl.BlockSpec((1, inner_p), lambda i: (0, 0)),     # b1
                    pl.BlockSpec((inner_p, nx_p), lambda i: (0, 0)),  # W2 (resident)
                    pl.BlockSpec((1, nx_p), lambda i: (0, 0)),        # b2
                ],
                out_specs=pl.BlockSpec((tm_eff, nx_p), lambda i: (i, 0)),
            ),
            compiler_params=pltpu.CompilerParams(
                dimension_semantics=("parallel",),
                vmem_limit_bytes=vmem_limit_bytes),
        )(x2d, w1_p, b1_p, w2_p, b2_p)
    else:
        kernel = functools.partial(mlp_streamed_kernel, act_dtype=act_dtype)
        grid = (m_p // tm_eff, inner_p // tk_eff)
        out2d = pl.pallas_call(
            kernel,
            out_shape=jax.ShapeDtypeStruct((m_p, nx_p), dtype),
            grid_spec=pltpu.PrefetchScalarGridSpec(
                num_scalar_prefetch=0,
                grid=grid,
                in_specs=[
                    pl.BlockSpec((tm_eff, nx_p), lambda i, k: (i, 0)),   # x tile
                    pl.BlockSpec((nx_p, tk_eff), lambda i, k: (0, k)),   # W1 col chunk
                    pl.BlockSpec((1, tk_eff), lambda i, k: (0, k)),      # b1 chunk
                    pl.BlockSpec((tk_eff, nx_p), lambda i, k: (k, 0)),   # W2 row chunk
                    pl.BlockSpec((1, nx_p), lambda i, k: (0, 0)),        # b2 (resident)
                ],
                out_specs=pl.BlockSpec((tm_eff, nx_p), lambda i, k: (i, 0)),
                scratch_shapes=[pltpu.VMEM((tm_eff, nx_p), jnp.float32)],
            ),
            compiler_params=pltpu.CompilerParams(
                dimension_semantics=("parallel", "arbitrary"),
                vmem_limit_bytes=vmem_limit_bytes),
        )(x2d, w1_p, b1_p, w2_p, b2_p)

    return out2d[:M, :nx].reshape(B, T, nx)


def make_params(key, nx, inner_dim, dtype=jnp.float32):
    """Deterministic init matching Conv1D: weight ~ N(0, 0.02), bias = 0."""
    k1, k2 = jax.random.split(key)
    w1 = (0.02 * jax.random.normal(k1, (nx, inner_dim))).astype(dtype)   # c_fc.weight
    b1 = jnp.zeros((inner_dim,), dtype)                                  # c_fc.bias
    w2 = (0.02 * jax.random.normal(k2, (inner_dim, nx))).astype(dtype)   # c_proj.weight
    b2 = jnp.zeros((nx,), dtype)                                         # c_proj.bias
    return w1, b1, w2, b2


if __name__ == "__main__":
    key = jax.random.PRNGKey(0)
    kx, kp, k_rest = jax.random.split(key, 3)

    # --- Test 1: toy f32 config (n_embd=32, inner=4*n_embd=128, B=2, T=8).
    #     Exercises the weights-resident path. ------------------------------
    B, T, NX, INNER = 2, 8, 32, 128
    x = jax.random.normal(kx, (B, T, NX), dtype=jnp.float32)
    w1, b1, w2, b2 = make_params(kp, NX, INNER, dtype=jnp.float32)

    out = mlp_forward(x, w1, b1, w2, b2)
    jax.block_until_ready(out)

    h_ref = _gelu_new_ref(x.reshape(-1, NX) @ w1 + b1)
    ref = (h_ref @ w2 + b2).reshape(B, T, NX)
    assert out.shape == (B, T, NX)
    assert jnp.allclose(out, ref, atol=1e-4, rtol=1e-4), "f32 mismatch"

    # --- Test 2: bf16 config (B=2, T=256, n_embd=256, inner=1024) run both
    #     through the resident path and the streamed (M, K) grid path. ------
    B2, T2, NX2, IN2 = 2, 256, 256, 1024
    kx2, kp2, kb1, kb2 = jax.random.split(k_rest, 4)
    xb = jax.random.normal(kx2, (B2, T2, NX2), dtype=jnp.float32).astype(jnp.bfloat16)
    w1b, _, w2b, _ = make_params(kp2, NX2, IN2, dtype=jnp.bfloat16)
    b1b = (0.02 * jax.random.normal(kb1, (IN2,))).astype(jnp.bfloat16)
    b2b = (0.02 * jax.random.normal(kb2, (NX2,))).astype(jnp.bfloat16)

    out_res = mlp_forward(xb, w1b, b1b, w2b, b2b)                       # resident path
    out_str = mlp_forward(xb, w1b, b1b, w2b, b2b, tm=256, tk=256,
                          weights_resident=False)                       # streamed path
    jax.block_until_ready((out_res, out_str))

    xf = xb.astype(jnp.float32).reshape(-1, NX2)
    hf = _gelu_new_ref(xf @ w1b.astype(jnp.float32) + b1b.astype(jnp.float32))
    hf = hf.astype(jnp.bfloat16).astype(jnp.float32)   # kernel feeds bf16 into dot 2
    reff = hf @ w2b.astype(jnp.float32) + b2b.astype(jnp.float32)
    refb = reff.astype(jnp.bfloat16).reshape(B2, T2, NX2)

    for name, o in (("resident", out_res), ("streamed", out_str)):
        err = jnp.max(jnp.abs(o.astype(jnp.float32) - refb.astype(jnp.float32)))
        assert o.shape == (B2, T2, NX2), name
        assert err < 5e-2, f"bf16 {name} mismatch, max abs err {err}"
    err_paths = jnp.max(jnp.abs(out_res.astype(jnp.float32)
                                - out_str.astype(jnp.float32)))
    assert err_paths < 2e-2, f"resident vs streamed mismatch {err_paths}"

    # TODO(synk): training-mode dropout (resid_pdrop) not implemented; eval-mode
    # identity is used, which matches inference semantics.
    print("KERNEL_OK")
</pallas_src>

<mosaic_0001>
module attributes {stable_mosaic.version = 11 : i64} {
  func.func @mlp_resident_kernel(%arg0: i32, %arg1: memref<16x128xf32, #tpu.memory_space<vmem>>, %arg2: memref<128x128xf32, #tpu.memory_space<vmem>>, %arg3: memref<1x128xf32, #tpu.memory_space<vmem>>, %arg4: memref<128x128xf32, #tpu.memory_space<vmem>>, %arg5: memref<1x128xf32, #tpu.memory_space<vmem>>, %arg6: memref<16x128xf32, #tpu.memory_space<vmem>>) attributes {dimension_semantics = [#tpu.dimension_semantics<parallel>], iteration_bounds = array<i64: 1>, scalar_prefetch = 0 : i64, scratch_operands = 0 : i64, tpu.core_type = #tpu.core_type<tc>, window_params = [{transform_indices = @transform_0, window_bounds = array<i64: 16, 128>}, {pipeline_mode = #tpu.pipeline_mode<synchronous>, transform_indices = @transform_1, window_bounds = array<i64: 128, 128>}, {pipeline_mode = #tpu.pipeline_mode<synchronous>, transform_indices = @transform_2, window_bounds = array<i64: 1, 128>}, {pipeline_mode = #tpu.pipeline_mode<synchronous>, transform_indices = @transform_3, window_bounds = array<i64: 128, 128>}, {pipeline_mode = #tpu.pipeline_mode<synchronous>, transform_indices = @transform_4, window_bounds = array<i64: 1, 128>}, {transform_indices = @transform_5, window_bounds = array<i64: 16, 128>}]} {
    %c0 = arith.constant 0 : index
    %c0_0 = arith.constant 0 : index
    %0 = vector.load %arg1[%c0, %c0_0] : memref<16x128xf32, #tpu.memory_space<vmem>>, vector<16x128xf32>
    %c0_1 = arith.constant 0 : index
    %c0_2 = arith.constant 0 : index
    %1 = vector.load %arg2[%c0_1, %c0_2] : memref<128x128xf32, #tpu.memory_space<vmem>>, vector<128x128xf32>
    %cst = arith.constant dense<0.000000e+00> : vector<16x128xf32>
    %2 = tpu.matmul %0, %1, %cst {dimension_numbers = #tpu.dot_dimension_numbers<[1], [0], [0], [1], [0, 0, 1, 1], [], []>} : vector<16x128xf32>, vector<128x128xf32>, vector<16x128xf32> -> vector<16x128xf32>
    %c0_3 = arith.constant 0 : index
    %c0_4 = arith.constant 0 : index
    %3 = vector.load %arg3[%c0_3, %c0_4] : memref<1x128xf32, #tpu.memory_space<vmem>>, vector<1x128xf32>
    %4 = vector.broadcast %3 : vector<1x128xf32> to vector<16x128xf32>
    %5 = arith.addf %2, %4 : vector<16x128xf32>
    %6 = arith.mulf %5, %5 : vector<16x128xf32>
    %cst_5 = arith.constant 0.0356774069 : f32
    %7 = vector.broadcast %cst_5 : f32 to vector<16x128xf32>
    %8 = arith.mulf %7, %6 : vector<16x128xf32>
    %cst_6 = arith.constant 0.797884583 : f32
    %9 = vector.broadcast %cst_6 : f32 to vector<16x128xf32>
    %10 = arith.addf %9, %8 : vector<16x128xf32>
    %11 = arith.mulf %5, %10 : vector<16x128xf32>
    %12 = math.tanh %11 : vector<16x128xf32>
    %cst_7 = arith.constant 5.000000e-01 : f32
    %13 = vector.broadcast %cst_7 : f32 to vector<16x128xf32>
    %14 = arith.mulf %13, %12 : vector<16x128xf32>
    %cst_8 = arith.constant 5.000000e-01 : f32
    %15 = vector.broadcast %cst_8 : f32 to vector<16x128xf32>
    %16 = arith.addf %15, %14 : vector<16x128xf32>
    %17 = arith.mulf %5, %16 : vector<16x128xf32>
    %c0_9 = arith.constant 0 : index
    %c0_10 = arith.constant 0 : index
    %18 = vector.load %arg4[%c0_9, %c0_10] : memref<128x128xf32, #tpu.memory_space<vmem>>, vector<128x128xf32>
    %cst_11 = arith.constant dense<0.000000e+00> : vector<16x128xf32>
    %19 = tpu.matmul %17, %18, %cst_11 {dimension_numbers = #tpu.dot_dimension_numbers<[1], [0], [0], [1], [0, 0, 1, 1], [], []>} : vector<16x128xf32>, vector<128x128xf32>, vector<16x128xf32> -> vector<16x128xf32>
    %c0_12 = arith.constant 0 : index
    %c0_13 = arith.constant 0 : index
    %20 = vector.load %arg5[%c0_12, %c0_13] : memref<1x128xf32, #tpu.memory_space<vmem>>, vector<1x128xf32>
    %21 = vector.broadcast %20 : vector<1x128xf32> to vector<16x128xf32>
    %22 = arith.addf %19, %21 : vector<16x128xf32>
    %c0_14 = arith.constant 0 : index
    %c0_15 = arith.constant 0 : index
    %23 = vector.load %arg6[%c0_14, %c0_15] : memref<16x128xf32, #tpu.memory_space<vmem>>, vector<16x128xf32>
    tpu.vector_store %arg6[%c0_14, %c0_15], %22 {strides = array<i32>} : memref<16x128xf32, #tpu.memory_space<vmem>>, vector<16x128xf32>,
    return
  }
  func.func @transform_0(%arg0: i32) -> (i32, i32) {
    %c0_i32 = arith.constant 0 : i32
    %c0_i32_0 = arith.constant 0 : i32
    return %arg0, %c0_i32 : i32, i32
  }
  func.func @transform_1(%arg0: i32) -> (i32, i32) {
    %c0_i32 = arith.constant 0 : i32
    %c0_i32_0 = arith.constant 0 : i32
    %c0_i32_1 = arith.constant 0 : i32
    return %c0_i32, %c0_i32_0 : i32, i32
  }
  func.func @transform_2(%arg0: i32) -> (i32, i32) {
    %c0_i32 = arith.constant 0 : i32
    %c0_i32_0 = arith.constant 0 : i32
    %c0_i32_1 = arith.constant 0 : i32
    return %c0_i32, %c0_i32_0 : i32, i32
  }
  func.func @transform_3(%arg0: i32) -> (i32, i32) {
    %c0_i32 = arith.constant 0 : i32
    %c0_i32_0 = arith.constant 0 : i32
    %c0_i32_1 = arith.constant 0 : i32
    return %c0_i32, %c0_i32_0 : i32, i32
  }
  func.func @transform_4(%arg0: i32) -> (i32, i32) {
    %c0_i32 = arith.constant 0 : i32
    %c0_i32_0 = arith.constant 0 : i32
    %c0_i32_1 = arith.constant 0 : i32
    return %c0_i32, %c0_i32_0 : i32, i32
  }
  func.func @transform_5(%arg0: i32) -> (i32, i32) {
    %c0_i32 = arith.constant 0 : i32
    %c0_i32_0 = arith.constant 0 : i32
    return %arg0, %c0_i32 : i32, i32
  }
}

</mosaic_0001>

<bundles_post_ra>
// kernel: mlp_forward.1
= control target key start
LH: loop header
LB: loop body
LE: loop exit
PB: predicated region body
PF: predicated region fallthrough
CT: control target
= control target key end

     0   :  { %s560_s1 = inlined_call_operand.vmem [shape: f32[128,128], index: 1, kind: input, shape index: {}]   ;;  %s561_s0 = inlined_call_operand.vmem [shape: f32[16,128], index: 0, kind: input, shape index: {}]   ;;  %s562_s3 = inlined_call_operand.vmem [shape: f32[128,128], index: 3, kind: input, shape index: {}]   ;;  %s563_s2 = inlined_call_operand.vmem [shape: f32[1,128], index: 2, kind: input, shape index: {}]   ;;  %s564_s4 = inlined_call_operand.vmem [shape: f32[1,128], index: 4, kind: input, shape index: {}]   ;;  %s565_s5 = inlined_call_operand.vmem [shape: f32[16,128], index: 5, kind: output, shape index: {}]  }
   0x1   :  { %v22_v0 = vld [vmem:[%s560_s1] sm:$0xff]  ;;  %v23_v1 = vld [vmem:[%s560_s1 + $0x8] sm:$0xff]  ;;  %v24_v2 = vld [vmem:[%s560_s1 + $0x10] sm:$0xff] }
   0x2   :  { %v348_v3 = vpack.c.bf16 %v23_v1, %v22_v0  ;;  %v25_v4 = vld [vmem:[%s560_s1 + $0x18] sm:$0xff]  ;;  %v26_v6 = vld [vmem:[%s560_s1 + $0x20] sm:$0xff]  ;;  %v27_v7 = vld [vmem:[%s560_s1 + $0x28] sm:$0xff] }
   0x3   :  { %v352_v5 = vpack.c.bf16 %v25_v4, %v24_v2  ;;  %v356_v8 = vpack.c.bf16 %v27_v7, %v26_v6  ;;  %v28_v9 = vld [vmem:[%s560_s1 + $0x30] sm:$0xff]  ;;  %v20_v10 = vld [vmem:[%s561_s0] sm:$0xff]  ;;  %v29_v11 = vld [vmem:[%s560_s1 + $0x38] sm:$0xff] }
   0x4   :  { %349 = vmatprep.subr.bf16.mxu0 %v348_v3  ;;  %310 = vmatprep.mubr.f32.mxu0 %v20_v10  ;;  %v136_v12 = vld [vmem:[%s562_s3] sm:$0xff]  ;;  %v137_v13 = vld [vmem:[%s562_s3 + $0x8] sm:$0xff]  ;;  %v360_v15 = vpack.c.bf16 %v29_v11, %v28_v9  ;;  %v32_v19 = vld [vmem:[%s560_s1 + $0x50] sm:$0xff] }
   0x5   :  { %351 = vmatpush3.bf16.msra.mxu0 %v348_v3  ;;  %v380_v14 = vpack.c.bf16 %v137_v13, %v136_v12  ;;  %v30_v16 = vld [vmem:[%s560_s1 + $0x40] sm:$0xff]  ;;  %v31_v17 = vld [vmem:[%s560_s1 + $0x48] sm:$0xff]  ;;  %v33_v20 = vld [vmem:[%s560_s1 + $0x58] sm:$0xff] }
   0x6   :  { %353 = vmatprep.subr.bf16.mxu0 %v352_v5  ;;  %v364_v18 = vpack.c.bf16 %v31_v17, %v30_v16  ;;  %v368_v21 = vpack.c.bf16 %v33_v20, %v32_v19  ;;  %v34_v22 = vld [vmem:[%s560_s1 + $0x60] sm:$0xff]  ;;  %v35_v23 = vld [vmem:[%s560_s1 + $0x68] sm:$0xff]  ;;  %v36_v25 = vld [vmem:[%s560_s1 + $0x70] sm:$0xff] }
   0x7   :  { %381 = vmatprep.subr.bf16.mxu1 %v380_v14  ;;  %v372_v24 = vpack.c.bf16 %v35_v23, %v34_v22  ;;  %v37_v26 = vld [vmem:[%s560_s1 + $0x78] sm:$0xff]  ;;  %v21_v28 = vld [vmem:[%s561_s0 + $0x8] sm:$0xff]  ;;  %v138_v29 = vld [vmem:[%s562_s3 + $0x10] sm:$0xff] }
   0x8   :  { %383 = vmatpush3.bf16.msra.mxu1 %v380_v14  ;;  %v376_v27 = vpack.c.bf16 %v37_v26, %v36_v25  ;;  %v139_v30 = vld [vmem:[%s562_s3 + $0x18] sm:$0xff]  ;;  %v140_v32 = vld [vmem:[%s562_s3 + $0x20] sm:$0xff]  ;;  %v141_v33 = vld [vmem:[%s562_s3 + $0x28] sm:$0xff] }
   0x9   :  { %355 = vmatpush3.bf16.msra.mxu0 %v352_v5  ;;  %v384_v31 = vpack.c.bf16 %v139_v30, %v138_v29  ;;  %v388_v34 = vpack.c.bf16 %v141_v33, %v140_v32  ;;  %v142_v35 = vld [vmem:[%s562_s3 + $0x30] sm:$0xff]  ;;  %v143_v36 = vld [vmem:[%s562_s3 + $0x38] sm:$0xff]  ;;  %v144_v38 = vld [vmem:[%s562_s3 + $0x40] sm:$0xff] }
   0xa   :  { %357 = vmatprep.subr.bf16.mxu0 %v356_v8  ;;  %v392_v37 = vpack.c.bf16 %v143_v36, %v142_v35  ;;  %v145_v39 = vld [vmem:[%s562_s3 + $0x48] sm:$0xff]  ;;  %v146_v40 = vld [vmem:[%s562_s3 + $0x50] sm:$0xff]  ;;  %v147_v42 = vld [vmem:[%s562_s3 + $0x58] sm:$0xff] }
   0xb   :  { %385 = vmatprep.subr.bf16.mxu1 %v384_v31  ;;  %v396_v41 = vpack.c.bf16 %v145_v39, %v144_v38  ;;  %v400_v43 = vpack.c.bf16 %v147_v42, %v146_v40  ;;  %v148_v44 = vld [vmem:[%s562_s3 + $0x60] sm:$0xff]  ;;  %v149_v45 = vld [vmem:[%s562_s3 + $0x68] sm:$0xff]  ;;  %v150_v47 = vld [vmem:[%s562_s3 + $0x70] sm:$0xff] }
   0xc   :  { %387 = vmatpush3.bf16.msra.mxu1 %v384_v31  ;;  %v404_v46 = vpack.c.bf16 %v149_v45, %v148_v44  ;;  %v151_v48 = vld [vmem:[%s562_s3 + $0x78] sm:$0xff]  ;;  %v240_v50 = vld [vmem:[%s563_s2] ss:$0 sm:$0xff] }
   0xd   :  { %359 = vmatpush3.bf16.msra.mxu0 %v356_v8  ;;  %389 = vmatprep.subr.bf16.mxu1 %v388_v34  ;;  %v408_v49 = vpack.c.bf16 %v151_v48, %v150_v47  ;;  %v241_v7 = vld [vmem:[%s564_s4] ss:$0 sm:$0xff] }
   0xe   :  { %361 = vmatprep.subr.bf16.mxu0 %v360_v15 }
  0x10   :  { %391 = vmatpush3.bf16.msra.mxu1 %v388_v34 }
  0x11   :  { %363 = vmatpush3.bf16.msra.mxu0 %v360_v15  ;;  %393 = vmatprep.subr.bf16.mxu1 %v392_v37 }
  0x12   :  { %365 = vmatprep.subr.bf16.mxu0 %v364_v18 }
  0x14   :  { %395 = vmatpush3.bf16.msra.mxu1 %v392_v37 }
  0x15   :  { %367 = vmatpush3.bf16.msra.mxu0 %v364_v18  ;;  %397 = vmatprep.subr.bf16.mxu1 %v396_v41 }
  0x16   :  { %369 = vmatprep.subr.bf16.mxu0 %v368_v21 }
  0x18   :  { %399 = vmatpush3.bf16.msra.mxu1 %v396_v41 }
  0x19   :  { %371 = vmatpush3.bf16.msra.mxu0 %v368_v21  ;;  %401 = vmatprep.subr.bf16.mxu1 %v400_v43 }
  0x1a   :  { %373 = vmatprep.subr.bf16.mxu0 %v372_v24 }
  0x1c   :  { %403 = vmatpush3.bf16.msra.mxu1 %v400_v43 }
  0x1d   :  { %375 = vmatpush3.bf16.msra.mxu0 %v372_v24  ;;  %405 = vmatprep.subr.bf16.mxu1 %v404_v46 }
  0x1e   :  { %377 = vmatprep.subr.bf16.mxu0 %v376_v27 }
  0x20   :  { %407 = vmatpush3.bf16.msra.mxu1 %v404_v46 }
  0x21   :  { %379 = vmatpush3.bf16.msra.mxu0 %v376_v27  ;;  %409 = vmatprep.subr.bf16.mxu1 %v408_v49 }
  0x24   :  { %311 = vmatmul.mubr.f32.vlgmr.msra.gmra.mrb[0].mxu0 %v21_v28  ;;  %411 = vmatpush3.bf16.msra.mxu1 %v408_v49 }
  0xf7   :  { %v312_v51 = vpop.f32.mrb[0].mxu0 }
  0xf8   :  { %v117_v52 = vadd.f32 %v312_v51, %v240_v50  ;;  %v111_v53 = vpop.f32.mrb[1].mxu0 }
  0xf9   :  { %v112_v54 = vadd.f32 %v240_v50, %v111_v53 }
  0xfa   :  { %v121_v55 = vmul.f32 %v117_v52, %v117_v52 }
  0xfb   :  { %v120_v56 = vmul.f32 %v112_v54, %v112_v54 }
  0xfc   :  { %v123_v57 = vmul.f32 0.035677407, %v121_v55 }
  0xfd   :  { %v122_v58 = vmul.f32 0.035677407, %v120_v56 }
  0xfe   :  { %v125_v59 = vadd.f32 0.7978846, %v123_v57 }
  0xff   :  { %v124_v60 = vadd.f32 0.7978846, %v122_v58 }
 0x100   :  { %v127_v61 = vmul.f32 %v125_v59, %v117_v52 }
 0x101   :  { %v126_v62 = vmul.f32 %v124_v60, %v112_v54 }
 0x102   :  { %412 = vtanh.f32 %v127_v61 }
 0x103   :  { %414 = vtanh.f32 %v126_v62 }
 0x10c   :  { %v413_v63 = vpop.eup %412 }
 0x10d   :  { %v415_v0 = vpop.eup %414  ;;  %v131_v1 = vmul.f32 0.5, %v413_v63 }
 0x10e   :  { %v130_v2 = vmul.f32 0.5, %v415_v0 }
 0x10f   :  { %v133_v3 = vadd.f32 0.5, %v131_v1 }
 0x110   :  { %v132_v4 = vadd.f32 0.5, %v130_v2 }
 0x111   :  { %v135_v6 = vmul.f32 %v133_v3, %v117_v52 }
 0x112   :  { %v134_v5 = vmul.f32 %v132_v4, %v112_v54 }
 0x114   :  { %345 = vmatprep.mubr.f32.mxu1 %v134_v5 }
 0x115   :  { %346 = vmatmul.mubr.f32.vlgmr.msra.gmra.mrb[0].mxu1 %v135_v6 }
 0x1e8   :  { %v347_v8 = vpop.f32.mrb[0].mxu1 }
 0x1e9   :  { %v231_v9 = vadd.f32 %v347_v8, %v241_v7  ;;  %v225_v10 = vpop.f32.mrb[1].mxu1 }
 0x1ea   :  { %v226_v11 = vadd.f32 %v241_v7, %v225_v10 }
 0x1eb   :  { %235 = vst [vmem:[%s565_s5 + $0x8] sm:$0xff] %v231_v9 }
 0x1ec   :  { %234 = vst [vmem:[%s565_s5] sm:$0xff] %v226_v11 }

</bundles_post_ra>
